<compile_context>
chip_gen: v5e
topology: v5e:2x2
jax: 0.10.0
libtpu: 0.0.40
codegen_flags: <defaults>
</compile_context>

<pallas_src>
import jax
import jax.numpy as jnp
from jax.experimental import pallas as pl
from jax.experimental.pallas import tpu as pltpu


def _round_up(x, m):
    return ((x + m - 1) // m) * m


def _so3conv_kernel(w_ref, x_ref, o_ref, acc_ref):
    # w_ref: (dim_out_p, TK)   x_ref: (TK, TM)   o_ref: (dim_out_p, TM)
    # acc_ref: (dim_out_p, TM) f32 scratch, resident across the K grid axis.
    k = pl.program_id(2)

    @pl.when(k == 0)
    def _():
        acc_ref[...] = jnp.zeros_like(acc_ref)

    acc_ref[...] += jnp.dot(
        w_ref[...], x_ref[...], preferred_element_type=jnp.float32
    )

    @pl.when(k == pl.num_programs(2) - 1)
    def _():
        o_ref[...] = acc_ref[...].astype(o_ref.dtype)


def basic_so3_conv(W, x, *, compute_dtype=None, tile_m_max=2048, tile_k_max=512):
    """W: (dim_out, dim_in*kernel_size); x: (bs, dim_in, kernel_size, np, na)."""
    bs, dim_in, ks, npts, na = x.shape
    dim_out, K = W.shape
    assert K == dim_in * ks
    M = npts * na
    out_dtype = x.dtype

    # Optional reduced-precision compute (e.g. jnp.bfloat16) — halves DMA bytes
    # on this HBM-bandwidth-bound op; accumulation stays f32.
    if compute_dtype is not None:
        W = W.astype(compute_dtype)
        x = x.astype(compute_dtype)

    x2 = x.reshape(bs, K, M)

    isz = x2.dtype.itemsize
    wsz = W.dtype.itemsize
    osz = jnp.dtype(out_dtype).itemsize
    sub = 8 if isz >= 4 else (32 // isz)  # sublane multiple (8 f32, 16 bf16)

    # ---- tile selection --------------------------------------------------
    TM = _round_up(M, 128) if M <= tile_m_max else tile_m_max
    if K <= tile_k_max:
        TK = _round_up(K, sub)           # single K step; tile == full padded K
    else:
        TK = tile_k_max                  # multiple of 128 -> legal W lane tile

    K_p = _round_up(K, TK)
    M_p = _round_up(M, TM)
    dim_out_p = _round_up(dim_out, sub)

    # ---- zero-pad to tile boundaries (zeros along K are exact no-ops) -----
    if (K_p, M_p) != (K, M):
        x2 = jnp.pad(x2, ((0, 0), (0, K_p - K), (0, M_p - M)))
    if (dim_out_p, K_p) != (dim_out, K):
        W = jnp.pad(W, ((0, dim_out_p - dim_out), (0, K_p - K)))

    grid = (bs, M_p // TM, K_p // TK)

    # VMEM budget: double-buffered x / out / W tiles + f32 accumulator.
    est = (2 * TK * TM * isz
           + 2 * dim_out_p * TM * osz
           + 2 * dim_out_p * TK * wsz
           + dim_out_p * TM * 4)
    vmem_limit = int(min(max(2 * est + (4 << 20), 32 << 20), 56 << 20))

    cost = pl.CostEstimate(
        flops=2 * bs * dim_out * K * M,
        transcendentals=0,
        bytes_accessed=bs * K * M * isz + bs * dim_out * M * osz + dim_out * K * wsz,
    )

    out = pl.pallas_call(
        _so3conv_kernel,
        out_shape=jax.ShapeDtypeStruct((bs, dim_out_p, M_p), out_dtype),
        grid_spec=pltpu.PrefetchScalarGridSpec(
            num_scalar_prefetch=0,
            grid=grid,
            in_specs=[
                # W: resident across batch / M tiles, walks K tiles.
                pl.BlockSpec((dim_out_p, TK), lambda b, m, k: (0, k)),
                # x: one (TK, TM) tile per step; leading batch dim squeezed.
                pl.BlockSpec((None, TK, TM), lambda b, m, k: (b, k, m)),
            ],
            out_specs=pl.BlockSpec((None, dim_out_p, TM),
                                   lambda b, m, k: (b, 0, m)),
            scratch_shapes=[pltpu.VMEM((dim_out_p, TM), jnp.float32)],
        ),
        compiler_params=pltpu.CompilerParams(
            dimension_semantics=("parallel", "parallel", "arbitrary"),
            vmem_limit_bytes=vmem_limit,
        ),
        cost_estimate=cost,
    )(W, x2)

    return out[:, :dim_out, :M].reshape(bs, dim_out, npts, na)


def init_weight(key, dim_out, dim_in, kernel_size, dtype=jnp.float32):
    # xavier_normal_ with gain = calculate_gain('relu') = sqrt(2), applied to a
    # (dim_out, dim_in, kernel_size) tensor:
    #   fan_in  = dim_in * kernel_size, fan_out = dim_out * kernel_size
    gain = jnp.sqrt(2.0)
    fan_in = dim_in * kernel_size
    fan_out = dim_out * kernel_size
    std = gain * jnp.sqrt(2.0 / (fan_in + fan_out))
    W = jax.random.normal(key, (dim_out, dim_in, kernel_size), dtype) * std
    return W.reshape(dim_out, dim_in * kernel_size)


def _reference(W, x):
    bs, dim_in, ks, npts, na = x.shape
    dim_out = W.shape[0]
    return jnp.matmul(
        W, x.reshape(bs, dim_in * ks, npts * na)
    ).reshape(bs, dim_out, npts, na)


if __name__ == "__main__":
    key = jax.random.PRNGKey(0)
    k1, k2, k3, k4 = jax.random.split(key, 4)

    # --- Test 1: small, fully aligned shapes (single tile) ----------------
    bs, dim_in, kernel_size, npts, na = 2, 4, 8, 16, 8
    dim_out = 16
    W = init_weight(k1, dim_out, dim_in, kernel_size)
    x = jax.random.normal(k2, (bs, dim_in, kernel_size, npts, na), jnp.float32)
    out = jax.block_until_ready(basic_so3_conv(W, x))
    ref = _reference(W, x)
    assert out.shape == (bs, dim_out, npts, na)
    assert jnp.allclose(out, ref, atol=1e-5, rtol=1e-5)

    # --- Test 2: unaligned channels/points (exercises wrapper padding) ----
    bs, dim_in, kernel_size, npts, na = 2, 6, 3, 37, 5
    dim_out = 10
    W = init_weight(k3, dim_out, dim_in, kernel_size)
    x = jax.random.normal(k4, (bs, dim_in, kernel_size, npts, na), jnp.float32)
    out = jax.block_until_ready(basic_so3_conv(W, x))
    ref = _reference(W, x)
    assert out.shape == (bs, dim_out, npts, na)
    assert jnp.allclose(out, ref, atol=1e-5, rtol=1e-5)

    # --- Test 3: large K (exercises the K-tiled accumulator path) ---------
    bs, dim_in, kernel_size, npts, na = 1, 40, 16, 16, 8   # K = 640 > 512
    dim_out = 32
    W = init_weight(k1, dim_out, dim_in, kernel_size)
    x = jax.random.normal(k2, (bs, dim_in, kernel_size, npts, na), jnp.float32)
    out = jax.block_until_ready(basic_so3_conv(W, x))
    ref = _reference(W, x)
    assert out.shape == (bs, dim_out, npts, na)
    assert jnp.allclose(out, ref, atol=1e-4, rtol=1e-4)

    print("KERNEL_OK")
</pallas_src>

<mosaic_0001>
module attributes {stable_mosaic.version = 11 : i64} {
  func.func @_so3conv_kernel(%arg0: i32, %arg1: i32, %arg2: i32, %arg3: memref<16x32xf32, #tpu.memory_space<vmem>>, %arg4: memref<1x32x128xf32, #tpu.memory_space<vmem>>, %arg5: memref<1x16x128xf32, #tpu.memory_space<vmem>>, %arg6: memref<16x128xf32, #tpu.memory_space<vmem>>) attributes {dimension_semantics = [#tpu.dimension_semantics<parallel>, #tpu.dimension_semantics<parallel>, #tpu.dimension_semantics<arbitrary>], iteration_bounds = array<i64: 2, 1, 1>, scalar_prefetch = 0 : i64, scratch_operands = 1 : i64, tpu.core_type = #tpu.core_type<tc>, window_params = [{transform_indices = @transform_0, window_bounds = array<i64: 16, 32>}, {transform_indices = @transform_1, window_bounds = array<i64: 1, 32, 128>}, {transform_indices = @transform_2, window_bounds = array<i64: 1, 16, 128>}]} {
    %c0_i32 = arith.constant 0 : i32
    %0 = arith.cmpi eq, %arg2, %c0_i32 : i32
    %1 = arith.extui %0 : i1 to i32
    %c0_i32_0 = arith.constant 0 : i32
    %2 = arith.cmpi ne, %1, %c0_i32_0 : i32
    scf.if %2 {
      %cst_11 = arith.constant 0.000000e+00 : f32
      %13 = vector.broadcast %cst_11 : f32 to vector<16x128xf32>
      %c0_12 = arith.constant 0 : index
      %c0_13 = arith.constant 0 : index
      %14 = vector.load %arg6[%c0_12, %c0_13] : memref<16x128xf32, #tpu.memory_space<vmem>>, vector<16x128xf32>
      tpu.vector_store %arg6[%c0_12, %c0_13], %13 {strides = array<i32>} : memref<16x128xf32, #tpu.memory_space<vmem>>, vector<16x128xf32>,
    } else {
    }
    %c0 = arith.constant 0 : index
    %c0_1 = arith.constant 0 : index
    %3 = vector.load %arg6[%c0, %c0_1] : memref<16x128xf32, #tpu.memory_space<vmem>>, vector<16x128xf32>
    %c0_2 = arith.constant 0 : index
    %c0_3 = arith.constant 0 : index
    %4 = vector.load %arg3[%c0_2, %c0_3] : memref<16x32xf32, #tpu.memory_space<vmem>>, vector<16x32xf32>
    %c0_4 = arith.constant 0 : index
    %c0_5 = arith.constant 0 : index
    %c0_6 = arith.constant 0 : index
    %5 = vector.load %arg4[%c0_4, %c0_5, %c0_6] : memref<1x32x128xf32, #tpu.memory_space<vmem>>, vector<1x32x128xf32>
    %6 = vector.shape_cast %5 : vector<1x32x128xf32> to vector<32x128xf32>
    %cst = arith.constant dense<0.000000e+00> : vector<16x128xf32>
    %7 = tpu.matmul %4, %6, %cst {dimension_numbers = #tpu.dot_dimension_numbers<[1], [0], [0], [1], [0, 0, 1, 1], [], []>} : vector<16x32xf32>, vector<32x128xf32>, vector<16x128xf32> -> vector<16x128xf32>
    %8 = arith.addf %3, %7 : vector<16x128xf32>
    %c0_7 = arith.constant 0 : index
    %c0_8 = arith.constant 0 : index
    %9 = vector.load %arg6[%c0_7, %c0_8] : memref<16x128xf32, #tpu.memory_space<vmem>>, vector<16x128xf32>
    tpu.vector_store %arg6[%c0_7, %c0_8], %8 {strides = array<i32>} : memref<16x128xf32, #tpu.memory_space<vmem>>, vector<16x128xf32>,
    %c0_i32_9 = arith.constant 0 : i32
    %10 = arith.cmpi eq, %arg2, %c0_i32_9 : i32
    %11 = arith.extui %10 : i1 to i32
    %c0_i32_10 = arith.constant 0 : i32
    %12 = arith.cmpi ne, %11, %c0_i32_10 : i32
    scf.if %12 {
      %c0_11 = arith.constant 0 : index
      %c0_12 = arith.constant 0 : index
      %13 = vector.load %arg6[%c0_11, %c0_12] : memref<16x128xf32, #tpu.memory_space<vmem>>, vector<16x128xf32>
      %c0_13 = arith.constant 0 : index
      %c0_14 = arith.constant 0 : index
      %c0_15 = arith.constant 0 : index
      %14 = vector.load %arg5[%c0_13, %c0_14, %c0_15] : memref<1x16x128xf32, #tpu.memory_space<vmem>>, vector<1x16x128xf32>
      %15 = vector.shape_cast %14 : vector<1x16x128xf32> to vector<16x128xf32>
      %16 = vector.shape_cast %13 : vector<16x128xf32> to vector<1x16x128xf32>
      tpu.vector_store %arg5[%c0_13, %c0_14, %c0_15], %16 {strides = array<i32>} : memref<1x16x128xf32, #tpu.memory_space<vmem>>, vector<1x16x128xf32>,
    } else {
    }
    return
  }
  func.func @transform_0(%arg0: i32, %arg1: i32, %arg2: i32) -> (i32, i32) {
    %c0_i32 = arith.constant 0 : i32
    %c0_i32_0 = arith.constant 0 : i32
    return %c0_i32, %arg2 : i32, i32
  }
  func.func @transform_1(%arg0: i32, %arg1: i32, %arg2: i32) -> (i32, i32, i32) {
    %c0_i32 = arith.constant 0 : i32
    return %arg0, %arg2, %arg1 : i32, i32, i32
  }
  func.func @transform_2(%arg0: i32, %arg1: i32, %arg2: i32) -> (i32, i32, i32) {
    %c0_i32 = arith.constant 0 : i32
    %c0_i32_0 = arith.constant 0 : i32
    return %arg0, %c0_i32, %arg1 : i32, i32, i32
  }
}

</mosaic_0001>

<bundles_post_ra>
// kernel: tpu_custom_call.1
= control target key start
LH: loop header
LB: loop body
LE: loop exit
PB: predicated region body
PF: predicated region fallthrough
CT: control target
= control target key end

     0   :  { %7 = vsyncpa [#allocation4], 0  ;;  %s819_s0 = inlined_call_operand.hbm [shape: f32[16,32], index: 0, kind: input, shape index: {}]   ;;  %s820_s1 = inlined_call_operand.hbm [shape: f32[2,32,128], index: 1, kind: input, shape index: {}]   ;;  %s821_s2 = inlined_call_operand.hbm [shape: f32[2,16,128], index: 2, kind: output, shape index: {}]  }
   0x1   :  { %8 = vsyncpa [#allocation7], 0 }
   0x2   :  { %10 = vsyncpa [#allocation7 + $0x1], 0 }
   0x3   :  { %11 = vsyncpa [#allocation5], 0 }
   0x4   :  { %13 = vsyncpa [#allocation5 + $0x1], 0  ;;  %s663_s9 = smov 0   ;;  %s665_s10 = smov 0  }
   0x5   :  { %s667_s11 = smov 0   ;;  %s669_s12 = smov 0  }
   0x6   :  { %s671_s13 = smov 0   ;;  %s673_s14 = smov 0  }
   0x7 LB: > { %s393_s15 = sadd.s32 4294967295, %s641_s14   ;;  %s394_s16 = sadd.s32 4294967294, %s641_s14   ;;  %s641_s14 = sphi %s673_s14, %s19_s14   ;;  %s637_s13 = sphi %s671_s13, %s833_s13   ;;  %s633_s12 = sphi %s669_s12, %s832_s12   ;;  %s629_s11 = sphi %s667_s11, %s831_s11   ;;  %s625_s10 = sphi %s665_s10, %s830_s10   ;;  %s621_s9 = sphi %s663_s9, %s829_s9  }
   0x8   : > { %p88_p0 = scmp.ne.s32.totalorder %s625_s10, %s621_s9  ;;  %p697_p1 = scmp.eq.s32.totalorder %s393_s15, 0 }
   0x9   : > { %p701_p2 = scmp.eq.s32.totalorder %s393_s15, 1  ;;  %p120_p3 = scmp.eq.s32.totalorder %s394_s16, 1 }
   0xa   : > { %p707_p4 = por %p697_p1, %p88_p0  ;;  %p395_p5 = scmp.ge.s32.totalorder %s641_s14, 1 }
   0xb   : > { %p712_p6 = por %p120_p3, %p88_p0  ;;  %p127_p7 = scmp.lt.s32.totalorder %s641_s14, 3 }
   0xc   : > { %s140_s23 = sshll.u32 %s819_s0, 4  ;;  %s643_s25 = smov [#allocation3]   ;;  %s141_s23 = int_to_ptr.hbm [resolvable:$true] %s140_s23 }
   0xd   : > { %p720_p8 = pnand %p395_p5, %p127_p7  ;;  %s142_s26 = sshll.u32 %s643_s25, 4  ;;  %s143_s26 = int_to_ptr.vmem [resolvable:$true] %s142_s26 }
   0xe   : > { %p397_p11 = scmp.ge.s32.totalorder %s641_s14, 2  ;;  %s644_s27 = smov 128  }
   0xf   : > { %p426_p9 = pneg %p720_p8  ;;  %s645_s28 = smov 8  }
  0x10   : > { %s38_s29 = sadd.s32 1, %s637_s13  ;;  %s75_s30 = sadd.s32 1, %s629_s11 }
  0x11   : > { %p427_p10 = pnand %p426_p9, %p697_p1  ;;  %p40_p12 = scmp.ge.s32.totalorder %s38_s29, 2 }
  0x12   : > { %p82_p13 = scmp.ne.s32.totalorder %s629_s11, %s625_s10  ;;  %p83_p0 = scmp.eq.s32.totalorder %s641_s14, 0 }
  0x13   : > { %429 = dma.hbm_to_vmem [thread:$0]  (!%p427_p10), %s141_s23, 256, %s143_s26, [#allocation4], %s644_s27, %s644_s27, %s645_s28  }
  0x14   : > { %s835_s29 = smov (%p40_p12, %s38_s29), 0  ;;  %p739_p3 = por %p83_p0, %p82_p13 }
  0x15   : > { %p745_p5 = por %p701_p2, %p82_p13  ;;  %s68_s5 = ssub.s32 %s637_s13, %s835_s29 }
  0x16   : > { %p439_p7 = scmp.lt.s32.totalorder %s641_s14, 2  ;;  %p73_p9 = scmp.eq.s32.totalorder %s68_s5, 0 }
  0x17   : > { %s156_s6 = sand.u32 1, %s629_s11   ;;  %s412_s15 = sshll.u32 %s637_s13, 5 }
  0x18   : > { %s398_s7 = sshll.u32 %s156_s6, 5  ;;  %s168_s22 = scalar_lea.hbm %s820_s1, %s412_s15 }
  0x19   : > { %s754_s8 = scalar_select %p73_p9, %s629_s11, %s75_s30  }
  0x1a   : > { %s160_s23 = scalar_lea.vmem [#allocation6], %s398_s7  ;;  %s169_s18 = sshll.u32 %s168_s22, 4  ;;  %s170_s18 = int_to_ptr.hbm [resolvable:$true] %s169_s18 }
  0x1b   : > { %s171_s25 = sshll.u32 %s160_s23, 4  ;;  %p431_p2 = pnand %p439_p7, %p739_p3  ;;  %s172_s25 = int_to_ptr.vmem [resolvable:$true] %s171_s25 }
  0x1c   : > { %s157_s26 = scalar_lea.sflag [#allocation7], %s156_s6  ;;  %183 = sbr.rel (%p720_p8) target bundleno = 177 (0xb1), region = 28 }
  0x1d   : > { %433 = dma.hbm_to_vmem [thread:$0]  (!%p431_p2), %s170_s18, 512, %s172_s25, %s157_s26, %s644_s27, %s644_s27, %s645_s28  }
  0x21   : > { %608 = dma.done.wait (%p697_p1), [#allocation4], 256  }
  0x22   : > { %610 = vsyncadd (%p697_p1), [#allocation4], 4294967040  ;;  %s772_s30 = sand.u32 1, %s625_s10  }
  0x23   : > { %s403_s3 = sshll.u32 %s772_s30, 5  ;;  %s191_s5 = scalar_lea.sflag [#allocation7], %s772_s30 }
  0x24   : > { %s194_s6 = scalar_lea.vmem [#allocation6], %s403_s3 }
  0x25   : > { %612 = dma.done.wait (%p707_p4), %s191_s5, 512  }
  0x26   : > { %614 = vsyncadd (%p707_p4), %s191_s5, 4294966784  ;;  %v230_v0 = vld [vmem:[%s194_s6 + $0x18] sm:$0xff]  ;;  %v229_v1 = vld [vmem:[%s194_s6 + $0x10] sm:$0xff]  ;;  %vm231_vm0 = vcmask 261120   ;;  %s404_s17 = sshll.u32 %s772_s30, 4  ;;  %s413_s19 = sshll.u32 %s633_s12, 4 }
  0x27   : > { %250 = vmatpush.msra.mxu0 %v230_v0  ;;  %414 = vmatpush.msra.mxu1 %v230_v0  ;;  %v228_v2 = vld [vmem:[%s194_s6 + $0x8] sm:$0xff]  ;;  %v227_v3 = vld [vmem:[%s194_s6] sm:$0xff]  ;;  %v225_v4 = vld [vmem:[#allocation3] sm:$0xff]  ;;  %s285_s28 = scalar_lea.hbm %s821_s2, %s413_s19  ;;  %s215_s7 = scalar_lea.vmem [#allocation8], %s404_s17 }
  0x28   : > { %v226_v5 = vld [vmem:[#allocation3 + $0x8] sm:$0xff]  ;;  %s286_s15 = sshll.u32 %s215_s7, 4  ;;  %s288_s16 = sshll.u32 %s285_s28, 4  ;;  %s287_s15 = int_to_ptr.vmem [resolvable:$true] %s286_s15  ;;  %s289_s16 = int_to_ptr.hbm [resolvable:$true] %s288_s16 }
  0x29   : > { %251 = vmatpush.msra.mxu0 %v229_v1  ;;  %415 = vmatpush.msra.mxu1 %v229_v1  ;;  %s273_s21 = scalar_lea.sflag [#allocation5], %s772_s30  ;;  %s569_s22 = sshra.s32 %s289_s16, 4  ;;  %s570_s22 = int_to_ptr.hbm [resolvable:$true] %s569_s22 }
  0x2a   : > { %s571_s23 = scalar_lea.hbm %s570_s22, 16  ;;  %s575_s18 = scalar_lea.hbm %s821_s2, 32 }
  0x2b   : > { %252 = vmatpush.msra.mxu0 %v228_v2  ;;  %416 = vmatpush.msra.mxu1 %v228_v2  ;;  %p572_p1 = scmp.ne.s32.totalorder %s570_s22, %s571_s23  ;;  %p576_p10 = scmp.lt.s32.totalorder %s570_s22, %s821_s2 }
  0x2c   : > { %p577_p12 = scmp.lt.s32.totalorder %s575_s18, %s571_s23 }
  0x2d   : > { %253 = vmatpush.msra.mxu0 %v227_v3  ;;  %417 = vmatpush.msra.mxu1 %v227_v3  ;;  %p573_p4 = pnand %p572_p1, %p745_p5 }
  0x2e   : > { %405 = vmatmul.msk.f32.vlgmr.msra.gmra.mxu0 %vm231_vm0, %v225_v4  ;;  %406 = vmatmul.msk.f32.vlgmr.msra.gmra.mxu1 %vm231_vm0, %v226_v5  ;;  %p578_p13 = por %p577_p12, %p576_p10 }
  0x2f   : > { %p574_p8 = pneg %p573_p4 }
  0x31   : > { %p579_p0 = pnand %p578_p13, %p574_p8 }
  0xab   : > { %v255_v6 = vpop.f32.mrf.mxu0  ;;  %v258_v7 = vpop.f32.mrf.mxu1 }
  0xac   : > { %270 = vst [vmem:[%s215_s7] sm:$0xff] %v255_v6 }
  0xad   : > { %271 = vst [vmem:[%s215_s7 + $0x8] sm:$0xff] %v258_v7 }
  0xae   : > { %582 = shalt.err (!%p579_p0)
}
  0xaf   : > { %s646_s30 = smov 128   ;;  %s647_s5 = smov 8  }
  0xb0   : > { %424 = dma.vmem_to_hbm [thread:$0]  (%p745_p5), %s287_s15, 256, %s289_s16, %s273_s21, %s646_s30, %s646_s30, %s647_s5  }
  0xb1 PF: > { %s303_s6 = sand.u32 1, %s621_s9   ;;  %p435_p3 = pnand %p397_p11, %p712_p6 }
  0xb2   : > { %s304_s17 = scalar_lea.sflag [#allocation5], %s303_s6 }
  0xb3   : > { %p436_p7 = pneg %p435_p3 }
  0xb5   : > { %616 = dma.done.wait (%p436_p7), %s304_s17, 256  }
  0xb6   : > { %618 = vsyncadd (%p436_p7), %s304_s17, 4294967040  ;;  %s19_s14 = sadd.s32 1, %s641_s14   ;;  %s829_s9 = smov %s625_s10 }
  0xb7   : > { %p16_p9 = scmp.ge.s32.totalorder %s19_s14, 4   ;;  %s830_s10 = smov %s629_s11 }
  0xb8   : > { %s831_s11 = smov %s754_s8  ;;  %s832_s12 = smov %s637_s13 }
  0xb9   : > { %s833_s13 = smov %s835_s29  ;;  %18 = sbr.rel (!%p16_p9) target bundleno = 7 (0x7), region = 87 }
  0xbe   :  { %310 = vsyncpa [#allocation4], 1 }
  0xbf   :  { %312 = vsyncpa [#allocation4 + $0x1], 1 }
  0xc0   :  { %313 = vsyncpa [#allocation7], 1 }
  0xc1   :  { %315 = vsyncpa [#allocation7 + $0x1], 1 }
  0xc2   :  { %316 = vsyncpa [#allocation5], 1 }
  0xc3   :  { %318 = vsyncpa [#allocation5 + $0x1], 1 }

</bundles_post_ra>
